<compile_context>
chip_gen: v7x
topology: tpu7x:2x2x1
jax: 0.10.0
libtpu: 0.0.40
codegen_flags: <defaults>
</compile_context>

<pallas_src>
import functools

import jax
import jax.numpy as jnp
import numpy as np
from jax import lax
from jax.experimental import pallas as pl
from jax.experimental.pallas import tpu as pltpu


def _cdiv(a, b):
    return -(-a // b)


def _round_up(a, b):
    return _cdiv(a, b) * b


def scse_kernel(x_ref, pmat_ref, pvec_ref, o_ref, *, Chp, hw_real, use_mxu):
    # Blocks stay in the I/O dtype in VMEM; compute in f32 in-register
    # (v5e VPU has no bf16 ops; f32 compute is required there anyway).
    x = x_ref[...].astype(jnp.float32)          # (Bt, C, HWp)
    pm = pmat_ref[...]                          # (C, 2*Chp + 256)  f32
    pv = pvec_ref[...]                          # (1, Chp + 128)    f32

    # 128-lane-aligned packed segments (padded hidden columns are exact zeros,
    # so they contribute nothing downstream).
    w1t = pm[:, 0:Chp]                          # (C, Chp)
    w2 = pm[:, Chp:2 * Chp]                     # (C, Chp)
    ws = pm[:, 2 * Chp:2 * Chp + 1]             # (C, 1)
    b2 = pm[:, 2 * Chp + 128:2 * Chp + 129]     # (C, 1)
    b1 = pv[:, 0:Chp]                           # (1, Chp)
    bs = pv[:, Chp:Chp + 1]                     # (1, 1)

    inv_hw = jnp.float32(1.0 / hw_real)         # real HW (lane padding is zero)

    if use_mxu:
        # ---- sSE spatial gate on the MXU: (1,C) x (C,HWp) contraction ------
        s = jnp.einsum("bch,co->boh", x, ws,
                       preferred_element_type=jnp.float32) + bs[None]   # (Bt,1,HWp)
        g1 = jax.nn.sigmoid(s)
        # ---- cSE channel gate: avg pool -> fc -> relu -> fc -> sigmoid -----
        m = jnp.sum(x, axis=2) * inv_hw                                  # (Bt, C)
        h = jnp.maximum(
            jnp.dot(m, w1t, preferred_element_type=jnp.float32) + b1, 0.0)  # (Bt, Chp)
        g2l = lax.dot_general(h, w2, (((1,), (1,)), ((), ())),
                              preferred_element_type=jnp.float32)        # (Bt, C)
        g2 = jax.nn.sigmoid(g2l[:, :, None] + b2[None])                  # (Bt, C, 1)
    else:
        # Small C: VPU/XLU path; channels stay on the sublane axis so the gate
        # broadcasts against x without any relayout.
        s = jnp.sum(x * ws[None], axis=1, keepdims=True) + bs[None]      # (Bt,1,HWp)
        g1 = jax.nn.sigmoid(s)
        m3 = jnp.sum(x, axis=2, keepdims=True) * inv_hw                  # (Bt, C, 1)
        h = jnp.maximum(
            jnp.sum(w1t[None] * m3, axis=1, keepdims=True) + b1[None], 0.0)  # (Bt,1,Chp)
        g2 = jax.nn.sigmoid(
            jnp.sum(w2[None] * h, axis=2, keepdims=True) + b2[None])     # (Bt, C, 1)

    # ---- fused gating: g1 * x + g2 * x, cast back to the I/O dtype ---------
    o_ref[...] = ((g1 + g2) * x).astype(o_ref.dtype)


def _padded_vmem_bytes(shape, itemsize=4):
    r, c = shape
    return _round_up(r, 8) * _round_up(c, 128) * itemsize


def scse_pallas(x_nchw, params):
    B, C, H, W = x_nchw.shape
    HW = H * W
    Ch = C // 2
    Chp = _round_up(max(Ch, 1), 128)            # 128-lane aligned hidden width
    ws, bs, w1t, b1, w2, b2 = params

    # Keep the I/O dtype (bf16 stays bf16 in HBM); compute in f32 in-kernel.
    io_dtype = x_nchw.dtype
    x3 = x_nchw.reshape(B, C, HW)

    # Lane-dense spatial axis: pad HW to a multiple of 128 (crop after).
    HWp = _round_up(HW, 128)
    if HWp != HW:
        x3 = jnp.pad(x3, ((0, 0), (0, 0), (0, HWp - HW)))

    # Pack the tiny parameters into two operands, each segment starting at a
    # 128-lane boundary, padded with zeros (fewer DMAs, no unaligned slices).
    def padcols(a, width):
        a = jnp.asarray(a, jnp.float32)
        return jnp.pad(a, ((0, 0), (0, width - a.shape[1])))

    pmat = jnp.concatenate(
        [padcols(w1t, Chp), padcols(w2, Chp), padcols(ws, 128), padcols(b2, 128)],
        axis=1)                                                  # (C, 2*Chp+256)
    pvec = jnp.concatenate([padcols(b1, Chp), padcols(bs, 128)], axis=1)  # (1, Chp+128)

    # ---- generation-aware block / VMEM budgeting ---------------------------
    try:
        vmem_cap = int(pltpu.get_tpu_info().vmem_capacity_bytes)
    except Exception:
        vmem_cap = 64 << 20                      # conservative (v7x-class)
    small_vmem = vmem_cap <= (64 << 20)          # v7x: 64 MiB VMEM, 2 TCs
    num_tc = 2 if small_vmem else 1
    target_block = (4 << 20) if small_vmem else (8 << 20)
    cap_limit = (48 << 20) if small_vmem else (64 << 20)

    itemsize = jnp.dtype(io_dtype).itemsize
    per_batch_io = C * HWp * itemsize
    per_batch_f32 = C * HWp * 4
    # Per grid step: double-buffered in + out blocks plus ~2 block-sized f32
    # compiler temps (the upcast copy and the gated product).
    per_batch_step = 4 * per_batch_io + 2 * per_batch_f32
    params_bytes = _padded_vmem_bytes(pmat.shape) + _padded_vmem_bytes(pvec.shape)
    slack = 4 << 20

    bt_vmem = max(1, (cap_limit - 2 * params_bytes - slack) // per_batch_step)
    bt_blk = max(1, target_block // per_batch_io)
    Bt = int(min(B, bt_vmem, bt_blk))

    # On 2-TC parts, keep the number of grid steps a multiple of 2 so the
    # "parallel" axis shards evenly across TensorCores (ragged last block OK).
    if num_tc > 1 and B >= num_tc and _cdiv(B, Bt) % num_tc != 0:
        for cand in range(Bt, 0, -1):
            if _cdiv(B, cand) % num_tc == 0:
                Bt = cand
                break
    nb = _cdiv(B, Bt)

    per_step = Bt * per_batch_step + 2 * params_bytes + slack
    vmem_limit = int(min(max(per_step, 32 << 20), vmem_cap - (8 << 20)))

    kernel = functools.partial(scse_kernel, Chp=Chp, hw_real=HW,
                               use_mxu=(C >= 128))

    out = pl.pallas_call(
        kernel,
        out_shape=jax.ShapeDtypeStruct((B, C, HWp), io_dtype),
        grid_spec=pltpu.PrefetchScalarGridSpec(
            num_scalar_prefetch=0,
            grid=(nb,),
            in_specs=[
                pl.BlockSpec((Bt, C, HWp), lambda b: (b, 0, 0)),        # x
                pl.BlockSpec((C, 2 * Chp + 256), lambda b: (0, 0)),     # packed mats
                pl.BlockSpec((1, Chp + 128), lambda b: (0, 0)),         # packed vecs
            ],
            out_specs=pl.BlockSpec((Bt, C, HWp), lambda b: (b, 0, 0)),
        ),
        compiler_params=pltpu.CompilerParams(
            dimension_semantics=("parallel",),
            vmem_limit_bytes=vmem_limit),
    )(x3, pmat, pvec)

    if HWp != HW:
        out = out[:, :, :HW]
    return out.reshape(B, C, H, W)


def make_params(key, C):
    """Deterministic synthetic weights; BN folded into the 1x1 convs."""
    Ch = C // 2
    eps = 1e-5
    ks = jax.random.split(key, 12)
    f32 = jnp.float32

    # sSE: Conv2d(C, 1, 1) + BN(1)
    w_s = 0.3 * jax.random.normal(ks[0], (C,), f32)
    b_s = 0.1 * jax.random.normal(ks[1], (), f32)
    g_s = 1.0 + 0.1 * jax.random.normal(ks[2], (), f32)
    beta_s = 0.1 * jax.random.normal(ks[3], (), f32)
    mean_s = 0.1 * jax.random.normal(ks[4], (), f32)
    var_s = 1.0 + 0.1 * jnp.abs(jax.random.normal(ks[5], (), f32))

    # cSE conv1: Conv2d(C, C/2, 1) + BN(C/2)
    w1 = 0.3 * jax.random.normal(ks[6], (Ch, C), f32)
    b1 = 0.1 * jax.random.normal(ks[7], (Ch,), f32)
    g1 = jnp.ones((Ch,), f32)
    beta1 = jnp.zeros((Ch,), f32)
    mean1 = 0.1 * jax.random.normal(ks[8], (Ch,), f32)
    var1 = 1.0 + 0.1 * jnp.abs(jax.random.normal(ks[9], (Ch,), f32))

    # cSE conv2: Conv2d(C/2, C, 1) + BN(C)
    w2 = 0.3 * jax.random.normal(ks[10], (C, Ch), f32)
    b2 = 0.1 * jax.random.normal(ks[11], (C,), f32)
    g2 = jnp.ones((C,), f32)
    beta2 = jnp.zeros((C,), f32)
    mean2 = jnp.zeros((C,), f32)
    var2 = jnp.ones((C,), f32)

    # Fold BN (eval mode) into the convs.
    scale_s = g_s / jnp.sqrt(var_s + eps)
    ws_eff = (w_s * scale_s).reshape(C, 1)
    bs_eff = ((b_s - mean_s) * scale_s + beta_s).reshape(1, 1)

    scale1 = g1 / jnp.sqrt(var1 + eps)
    w1_eff = w1 * scale1[:, None]                    # (Ch, C)
    b1_eff = ((b1 - mean1) * scale1 + beta1).reshape(1, Ch)
    w1t_eff = w1_eff.T                               # (C, Ch)

    scale2 = g2 / jnp.sqrt(var2 + eps)
    w2_eff = w2 * scale2[:, None]                    # (C, Ch)
    b2_eff = ((b2 - mean2) * scale2 + beta2).reshape(C, 1)

    return (ws_eff, bs_eff, w1t_eff, b1_eff, w2_eff, b2_eff)


def scse_reference(x_nchw, params):
    """Pure-JAX reference with identical (BN-folded) semantics."""
    ws, bs, w1t, b1, w2, b2 = params
    B, C, H, W = x_nchw.shape
    x3 = x_nchw.reshape(B, C, H * W)
    # sSE
    g1 = jax.nn.sigmoid(jnp.einsum("co,bchw->bohw",
                                   ws.reshape(C, 1), x_nchw) + bs[0, 0])  # (B,1,H,W)
    # cSE
    m = jnp.mean(x3, axis=2)                                              # (B, C)
    h = jnp.maximum(m @ w1t + b1, 0.0)                                    # (B, Ch)
    g2 = jax.nn.sigmoid(h @ w2.T + b2[:, 0][None, :])                     # (B, C)
    g2 = g2[:, :, None, None]
    return g1 * x_nchw + g2 * x_nchw


if __name__ == "__main__":
    B, C, H, W = 2, 4, 16, 16
    key = jax.random.PRNGKey(0)
    kx, kp = jax.random.split(key)
    x = jax.random.normal(kx, (B, C, H, W), jnp.float32)
    params = make_params(kp, C)

    # f32 path
    out = scse_pallas(x, params)
    out = jax.block_until_ready(out)
    ref = scse_reference(x, params)
    np.testing.assert_allclose(np.asarray(out), np.asarray(ref),
                               rtol=1e-5, atol=1e-5)

    # bf16 I/O path (HBM traffic stays bf16; compute is f32 in-register)
    x_bf = x.astype(jnp.bfloat16)
    out_bf = jax.block_until_ready(scse_pallas(x_bf, params))
    ref_bf = scse_reference(x_bf.astype(jnp.float32), params)
    np.testing.assert_allclose(np.asarray(out_bf, dtype=np.float32),
                               np.asarray(ref_bf),
                               rtol=2e-2, atol=2e-2)

    print("KERNEL_OK")
</pallas_src>

<mosaic_0001>
module attributes {stable_mosaic.version = 11 : i64} {
  func.func @scse_kernel(%arg0: i32, %arg1: memref<1x4x256xf32, #tpu.memory_space<vmem>>, %arg2: memref<4x512xf32, #tpu.memory_space<vmem>>, %arg3: memref<1x256xf32, #tpu.memory_space<vmem>>, %arg4: memref<1x4x256xf32, #tpu.memory_space<vmem>>) attributes {dimension_semantics = [#tpu.dimension_semantics<parallel>], iteration_bounds = array<i64: 2>, scalar_prefetch = 0 : i64, scratch_operands = 0 : i64, tpu.core_type = #tpu.core_type<tc>, window_params = [{transform_indices = @transform_0, window_bounds = array<i64: 1, 4, 256>}, {pipeline_mode = #tpu.pipeline_mode<synchronous>, transform_indices = @transform_1, window_bounds = array<i64: 4, 512>}, {pipeline_mode = #tpu.pipeline_mode<synchronous>, transform_indices = @transform_2, window_bounds = array<i64: 1, 256>}, {transform_indices = @transform_3, window_bounds = array<i64: 1, 4, 256>}]} {
    %c0 = arith.constant 0 : index
    %c0_0 = arith.constant 0 : index
    %c0_1 = arith.constant 0 : index
    %0 = vector.load %arg1[%c0, %c0_0, %c0_1] : memref<1x4x256xf32, #tpu.memory_space<vmem>>, vector<1x4x256xf32>
    %c0_2 = arith.constant 0 : index
    %c0_3 = arith.constant 0 : index
    %1 = vector.load %arg2[%c0_2, %c0_3] : memref<4x512xf32, #tpu.memory_space<vmem>>, vector<4x512xf32>
    %c0_4 = arith.constant 0 : index
    %c0_5 = arith.constant 0 : index
    %2 = vector.load %arg3[%c0_4, %c0_5] : memref<1x256xf32, #tpu.memory_space<vmem>>, vector<1x256xf32>
    %3 = vector.extract_strided_slice %1 {offsets = [0, 0], sizes = [4, 128], strides = [1, 1]} : vector<4x512xf32> to vector<4x128xf32>
    %4 = vector.extract_strided_slice %1 {offsets = [0, 128], sizes = [4, 128], strides = [1, 1]} : vector<4x512xf32> to vector<4x128xf32>
    %5 = vector.extract_strided_slice %1 {offsets = [0, 256], sizes = [4, 1], strides = [1, 1]} : vector<4x512xf32> to vector<4x1xf32>
    %6 = vector.extract_strided_slice %1 {offsets = [0, 384], sizes = [4, 1], strides = [1, 1]} : vector<4x512xf32> to vector<4x1xf32>
    %7 = vector.extract_strided_slice %2 {offsets = [0, 0], sizes = [1, 128], strides = [1, 1]} : vector<1x256xf32> to vector<1x128xf32>
    %8 = vector.extract_strided_slice %2 {offsets = [0, 128], sizes = [1, 1], strides = [1, 1]} : vector<1x256xf32> to vector<1x1xf32>
    %9 = vector.shape_cast %5 : vector<4x1xf32> to vector<1x4x1xf32>
    %10 = vector.broadcast %9 : vector<1x4x1xf32> to vector<1x4x256xf32>
    %11 = arith.mulf %0, %10 : vector<1x4x256xf32>
    %cst = arith.constant dense<0.000000e+00> : vector<1x256xf32>
    %12 = vector.multi_reduction <add>, %11, %cst [1] : vector<1x4x256xf32> to vector<1x256xf32>
    %13 = vector.shape_cast %12 : vector<1x256xf32> to vector<1x1x256xf32>
    %14 = vector.shape_cast %8 : vector<1x1xf32> to vector<1x1x1xf32>
    %15 = vector.broadcast %14 : vector<1x1x1xf32> to vector<1x1x256xf32>
    %16 = arith.addf %13, %15 : vector<1x1x256xf32>
    %17 = arith.negf %16 : vector<1x1x256xf32>
    %18 = math.exp %17 : vector<1x1x256xf32>
    %cst_6 = arith.constant 1.000000e+00 : f32
    %19 = vector.broadcast %cst_6 : f32 to vector<1x1x256xf32>
    %20 = arith.addf %19, %18 : vector<1x1x256xf32>
    %21 = arith.divf %19, %20 : vector<1x1x256xf32>
    %cst_7 = arith.constant dense<0.000000e+00> : vector<1x4xf32>
    %22 = vector.multi_reduction <add>, %0, %cst_7 [2] : vector<1x4x256xf32> to vector<1x4xf32>
    %23 = vector.shape_cast %22 : vector<1x4xf32> to vector<1x4x1xf32>
    %cst_8 = arith.constant 3.906250e-03 : f32
    %24 = vector.broadcast %cst_8 : f32 to vector<1x4x1xf32>
    %25 = arith.mulf %23, %24 : vector<1x4x1xf32>
    %26 = vector.shape_cast %3 : vector<4x128xf32> to vector<1x4x128xf32>
    %27 = vector.broadcast %25 : vector<1x4x1xf32> to vector<1x4x128xf32>
    %28 = arith.mulf %26, %27 : vector<1x4x128xf32>
    %cst_9 = arith.constant dense<0.000000e+00> : vector<1x128xf32>
    %29 = vector.multi_reduction <add>, %28, %cst_9 [1] : vector<1x4x128xf32> to vector<1x128xf32>
    %30 = vector.shape_cast %29 : vector<1x128xf32> to vector<1x1x128xf32>
    %31 = vector.shape_cast %7 : vector<1x128xf32> to vector<1x1x128xf32>
    %32 = arith.addf %30, %31 : vector<1x1x128xf32>
    %cst_10 = arith.constant 0.000000e+00 : f32
    %33 = vector.broadcast %cst_10 : f32 to vector<1x1x128xf32>
    %34 = arith.maximumf %32, %33 : vector<1x1x128xf32>
    %35 = vector.shape_cast %4 : vector<4x128xf32> to vector<1x4x128xf32>
    %36 = vector.broadcast %34 : vector<1x1x128xf32> to vector<1x4x128xf32>
    %37 = arith.mulf %35, %36 : vector<1x4x128xf32>
    %cst_11 = arith.constant dense<0.000000e+00> : vector<1x4xf32>
    %38 = vector.multi_reduction <add>, %37, %cst_11 [2] : vector<1x4x128xf32> to vector<1x4xf32>
    %39 = vector.shape_cast %38 : vector<1x4xf32> to vector<1x4x1xf32>
    %40 = vector.shape_cast %6 : vector<4x1xf32> to vector<1x4x1xf32>
    %41 = arith.addf %39, %40 : vector<1x4x1xf32>
    %42 = arith.negf %41 : vector<1x4x1xf32>
    %43 = math.exp %42 : vector<1x4x1xf32>
    %cst_12 = arith.constant 1.000000e+00 : f32
    %44 = vector.broadcast %cst_12 : f32 to vector<1x4x1xf32>
    %45 = arith.addf %44, %43 : vector<1x4x1xf32>
    %46 = arith.divf %44, %45 : vector<1x4x1xf32>
    %47 = vector.broadcast %21 : vector<1x1x256xf32> to vector<1x4x256xf32>
    %48 = vector.broadcast %46 : vector<1x4x1xf32> to vector<1x4x256xf32>
    %49 = arith.addf %47, %48 : vector<1x4x256xf32>
    %50 = arith.mulf %49, %0 : vector<1x4x256xf32>
    %c0_13 = arith.constant 0 : index
    %c0_14 = arith.constant 0 : index
    %c0_15 = arith.constant 0 : index
    %51 = vector.load %arg4[%c0_13, %c0_14, %c0_15] : memref<1x4x256xf32, #tpu.memory_space<vmem>>, vector<1x4x256xf32>
    tpu.vector_store %arg4[%c0_13, %c0_14, %c0_15], %50 {strides = array<i32>} : memref<1x4x256xf32, #tpu.memory_space<vmem>>, vector<1x4x256xf32>,
    return
  }
  func.func @transform_0(%arg0: i32) -> (i32, i32, i32) {
    %c0_i32 = arith.constant 0 : i32
    %c0_i32_0 = arith.constant 0 : i32
    %c0_i32_1 = arith.constant 0 : i32
    return %arg0, %c0_i32, %c0_i32_0 : i32, i32, i32
  }
  func.func @transform_1(%arg0: i32) -> (i32, i32) {
    %c0_i32 = arith.constant 0 : i32
    %c0_i32_0 = arith.constant 0 : i32
    %c0_i32_1 = arith.constant 0 : i32
    return %c0_i32, %c0_i32_0 : i32, i32
  }
  func.func @transform_2(%arg0: i32) -> (i32, i32) {
    %c0_i32 = arith.constant 0 : i32
    %c0_i32_0 = arith.constant 0 : i32
    %c0_i32_1 = arith.constant 0 : i32
    return %c0_i32, %c0_i32_0 : i32, i32
  }
  func.func @transform_3(%arg0: i32) -> (i32, i32, i32) {
    %c0_i32 = arith.constant 0 : i32
    %c0_i32_0 = arith.constant 0 : i32
    %c0_i32_1 = arith.constant 0 : i32
    return %arg0, %c0_i32, %c0_i32_0 : i32, i32, i32
  }
}

</mosaic_0001>

<bundles_post_ra>
// kernel: tpu_custom_call.1
= control target key start
LH: loop header
LB: loop body
LE: loop exit
PB: predicated region body
PF: predicated region fallthrough
CT: control target
= control target key end

     0   :  { %8 = vsyncpa [#allocation3], 0  ;;  %s882_s0 = inlined_call_operand.hbm [shape: f32[2,4,256], index: 0, kind: input, shape index: {}]   ;;  %s883_s1 = inlined_call_operand.hbm [shape: f32[4,512], index: 1, kind: input, shape index: {}]   ;;  %s884_s2 = inlined_call_operand.vmem [shape: f32[1,256], index: 2, kind: input, shape index: {}]   ;;  %s885_s3 = inlined_call_operand.hbm [shape: f32[2,4,256], index: 3, kind: output, shape index: {}]  }
   0x1   :  { %10 = vsyncpa [#allocation3 + $0x1], 0 }
   0x2   :  { %11 = vsyncpa [#allocation6], 0 }
   0x3   :  { %12 = vsyncpa [#allocation4], 0 }
   0x4   :  { %14 = vsyncpa [#allocation4 + $0x1], 0  ;;  %s657_s12 = smov 0   ;;  %s659_s13 = smov 0  }
   0x5   :  { %s661_s14 = smov 0   ;;  %s663_s15 = smov 0  }
   0x6 LB: > { %s678_s16 = sadd.s32 4294967295, %s630_s15   ;;  %s407_s17 = sadd.s32 4294967294, %s630_s15   ;;  %s630_s15 = sphi %s663_s15, %s909_s15   ;;  %s626_s14 = sphi %s661_s14, %s908_s14   ;;  %s622_s13 = sphi %s659_s13, %s907_s13   ;;  %s618_s12 = sphi %s657_s12, %s906_s12  }
   0x7   : > { %p40_p0 = scmp.ne.s32.totalorder %s622_s13, %s618_s12  ;;  %p886_p1 = scmp.eq.s32.totalorder %s678_s16, 0 }
   0x8   : > { %p112_p3 = scmp.eq.s32.totalorder %s407_s17, 1  ;;  %p408_p5 = scmp.ge.s32.totalorder %s630_s15, 1 }
   0x9   : > { %p687_p4 = por %p886_p1, %p40_p0  ;;  %p119_p7 = scmp.lt.s32.totalorder %s630_s15, 3 }
   0xa   : > { %p692_p6 = por %p112_p3, %p40_p0  ;;  %s632_s21 = smov [#allocation5]  }
   0xb   : > { %s889_s18 = scalar_select %p687_p4, 1, 0 }
   0xc   : > { %s890_s19 = scalar_select %p692_p6, 1, 0 }
   0xd   : > { %p697_p8 = pnand %p408_p5, %p119_p7  ;;  %s132_s22 = sshll.u32 %s632_s21, 4  ;;  %s133_s22 = int_to_ptr.vmem [resolvable:$true] %s132_s22 }
   0xe   : > { %s705_s23 = sadd.s32 1, %s630_s15   ;;  %s27_s27 = sadd.s32 1, %s626_s14 }
   0xf   : > { %s891_s20 = scalar_select %p697_p8, 1, 0 }
  0x10   : > { %p436_p10 = pneg %p697_p8  ;;  %s24_s25 = ssub.s32 %s630_s15, %s705_s23 }
  0x11   : > { %p715_p12 = scmp.eq.s32.totalorder %s24_s25, 0  ;;  %s502_s30 = scalar_lea.hbm %s883_s1, 256 }
  0x12   : > { %p709_p11 = pnand %p436_p10, %p886_p1  ;;  %p503_p0 = scmp.ne.s32.totalorder %s883_s1, %s502_s30 }
  0x13   : > { %s893_s26 = scalar_select %p715_p12, 1, 0 }
  0x14   : > { %p504_p3 = pneg %p709_p11  ;;  %p509_p10 = scmp.lt.u32.totalorder %s502_s30, %s883_s1 }
  0x16   : > { %p505_p5 = pnand %p504_p3, %p503_p0 }
  0x18   : > { %p506_p7 = pneg %p505_p5 }
  0x1a   : > { %p511_p9 = pnand %p509_p10, %p506_p7 }
  0x1c   : > { %514 = shalt.err (!%p511_p9)
}
  0x1d   : > { %s515_s8 = scalar_lea.vmem %s133_s22, 256  ;;  %p523_p6 = scmp.lt.s32.totalorder %s133_s22, %s133_s22 }
  0x1e   : > { %p516_p1 = scmp.ne.s32.totalorder %s133_s22, %s515_s8  ;;  %p524_p4 = scmp.lt.s32.totalorder %s515_s8, %s515_s8 }
  0x20   : > { %p518_p2 = pnand %p516_p1, %p504_p3  ;;  %p525_p8 = por %p524_p4, %p523_p6 }
  0x22   : > { %p519_p13 = pneg %p518_p2 }
  0x24   : > { %p526_p12 = pnand %p525_p8, %p519_p13 }
  0x26   : > { %529 = shalt.err (!%p526_p12)
}
  0x27   : > { %439 = dma.hbm_to_vmem [thread:$0]  (!%p709_p11), %s883_s1, 256, %s133_s22, [#allocation6]  }
  0x28   : > { %p894_p1 = scmp.ne.s32.totalorder %s893_s26, 0  ;;  %p35_p2 = scmp.eq.s32.totalorder %s630_s15, 0 }
  0x29   : > { %p895_p4 = scmp.ne.s32.totalorder %s626_s14, %s622_s13  ;;  %p896_p6 = scmp.eq.s32.totalorder %s678_s16, 1 }
  0x2a   : > { %s741_s11 = scalar_select %p894_p1, %s626_s14, %s27_s27  }
  0x2b   : > { %p749_p8 = por %p896_p6, %p895_p4  ;;  %p449_p9 = scmp.lt.s32.totalorder %s630_s15, 2 }
  0x2c   : > { %s146_s21 = sand.u32 1, %s626_s14   ;;  %p898_p12 = pmov %p895_p4 }
  0x2d   : > { %s411_s24 = sshll.u32 %s146_s21, 3  ;;  %s426_s25 = sshll.u32 %s630_s15, 7 }
  0x2e   : > { %p36_p13 = por %p35_p2, %p898_p12  ;;  %s762_s22 = scalar_lea.hbm %s882_s0, %s426_s25 }
  0x2f   : > { %s150_s26 = scalar_lea.vmem [#allocation2], %s411_s24  ;;  %s147_s4 = scalar_lea.sflag [#allocation3], %s146_s21 }
  0x30   : > { %s158_s27 = sshll.u32 %s150_s26, 4  ;;  %p764_p11 = pnand %p449_p9, %p36_p13  ;;  %s768_s27 = int_to_ptr.vmem [resolvable:$true] %s158_s27 }
  0x31   : > { %s530_s5 = scalar_lea.hbm %s762_s22, 128  ;;  %s535_s8 = scalar_lea.hbm %s882_s0, 256 }
  0x32   : > { %p531_p0 = scmp.ne.s32.totalorder %s762_s22, %s530_s5  ;;  %p532_p3 = pneg %p764_p11 }
  0x33   : > { %p536_p10 = scmp.lt.u32.totalorder %s762_s22, %s882_s0  ;;  %p537_p1 = scmp.lt.u32.totalorder %s535_s8, %s530_s5 }
  0x34   : > { %p533_p5 = pnand %p532_p3, %p531_p0  ;;  %p539_p4 = scmp.lt.u32.totalorder %s530_s5, %s762_s22 }
  0x35   : > { %p538_p2 = por %p537_p1, %p536_p10 }
  0x36   : > { %p534_p7 = pneg %p533_p5 }
  0x37   : > { %p540_p6 = por %p539_p4, %p538_p2 }
  0x39   : > { %p541_p9 = pnand %p540_p6, %p534_p7 }
  0x3b   : > { %544 = shalt.err (!%p541_p9)
}
  0x3c   : > { %s545_s21 = scalar_lea.vmem %s768_s27, 128  ;;  %s633_s24 = smov [#allocation2]  }
  0x3d   : > { %p546_p12 = scmp.ne.s32.totalorder %s768_s27, %s545_s21  ;;  %s550_s25 = sshll.u32 %s633_s24, 4  ;;  %s551_s25 = int_to_ptr.vmem [resolvable:$false] %s550_s25 }
  0x3e   : > { %s552_s28 = scalar_lea.vmem %s551_s25, 256  ;;  %p553_p5 = scmp.lt.s32.totalorder %s768_s27, %s551_s25 }
  0x3f   : > { %p548_p13 = pnand %p546_p12, %p532_p3  ;;  %p554_p10 = scmp.lt.s32.totalorder %s552_s28, %s545_s21 }
  0x41   : > { %p549_p0 = pneg %p548_p13  ;;  %p555_p1 = por %p554_p10, %p553_p5 }
  0x43   : > { %p556_p2 = pnand %p555_p1, %p549_p0 }
  0x45   : > { %559 = shalt.err (!%p556_p2)
}
  0x46   : > { %443 = dma.hbm_to_vmem [thread:$0]  (!%p764_p11), %s762_s22, 128, %s768_s27, %s147_s4  }
  0x47   : > { %p900_p7 = scmp.ne.s32.totalorder %s891_s20, 0 }
  0x48   : > { %s798_s29 = sand.u32 (!%p900_p7), 1, %s622_s13   ;;  %p901_p3 = scmp.ne.s32.totalorder (!%p900_p7), %s889_s18, 0 }
  0x49   : > { %167 = sbr.rel (%p900_p7) target bundleno = 576 (0x240), region = 32  ;;  %s415_s26 = sshll.u32 (!%p900_p7), %s798_s29, 3 }
  0x4a   : > { %s170_s5 = scalar_lea.sflag (!%p900_p7), [#allocation3], %s798_s29  ;;  %s173_s6 = scalar_lea.vmem (!%p900_p7), [#allocation2], %s415_s26 }
  0x50   : > { %605 = dma.done.wait (%p901_p3), %s170_s5, 128  }
  0x51   : > { %607 = vsyncadd (%p901_p3), %s170_s5, 4294967168  ;;  %p902_p11 = scmp.eq.s32.totalorder %s678_s16, 0 }
  0x53   : > { %609 = dma.done.wait (%p902_p11), [#allocation6], 256   ;;  %p903_p4 = pmov %p902_p11 }
  0x54   : > { %vm220_vm0 = vcmask 1043456   ;;  %v812_v0 = vld [vmem:[%s173_s6] sm:$0xff]  ;;  %v202_v5 = vld [vmem:[#allocation5 + $0x8] sm:$0xff]  ;;  %v634_v7 = vmov 0   ;;  %v201_v9 = vld [vmem:[#allocation5] sm:$0xff]  ;;  %v212_v17 = vlaneseq  ;;  %s427_s22 = sshll.u32 %s678_s16, 7 }
  0x55   : > { %611 = vsyncadd (%p903_p4), [#allocation6], 4294967040  ;;  %v816_v1 = vcombine.high %v812_v0, %v812_v0  ;;  %v262_v2 = vsel %vm220_vm0, %v812_v0, 0.0  ;;  %v203_v6 = vld [vmem:[%s884_s2] sm:$0x3]  ;;  %487 = vset.pattern.permute.xlu1 %v634_v7  ;;  %488 = vset.pattern.permute.xlu0 %v634_v7  ;;  %v279_v25 = vrot.slane %v201_v9, 4  ;;  %s838_s8 = scalar_lea.hbm %s885_s3, %s427_s22 }
  0x56   : > { %206 = vperm.xlu1 %487, %v202_v5   ;;  %v236_v8 = vrot.slane %v203_v6, 1  ;;  %v213_v20 = vshrl.u32 %v212_v17, 7  ;;  %v289_v29 = vrot.slane %v202_v5, 4  ;;  %v635_v36 = vmov 839922192   ;;  %s199_s27 = scalar_lea.vmem [#allocation7], %s415_s26 }
  0x57   : > { %v263_v3 = vsel %vm220_vm0, %v816_v1, 0.0  ;;  %v210_v37 = vunpack.c.l.s4 %v635_v36  ;;  %s327_s30 = sshll.u32 %s199_s27, 4  ;;  %s313_s16 = scalar_lea.sflag [#allocation4], %s798_s29  ;;  %s840_s30 = int_to_ptr.vmem [resolvable:$true] %s327_s30 }
  0x58   : > { %v264_v4 = vadd.f32 %v263_v3, %v262_v2  ;;  %v243_v22 = vsub.s32 0, %v213_v20  ;;  %s560_s9 = scalar_lea.vmem %s840_s30, 128  ;;  %s636_s10 = smov [#allocation7]  }
  0x59   : > { %v211_v38 = vunpack.c.0.s8 %v210_v37  ;;  %p561_p6 = scmp.ne.s32.totalorder %s840_s30, %s560_s9  ;;  %s564_s21 = sshll.u32 %s636_s10, 4  ;;  %s565_s21 = int_to_ptr.vmem [resolvable:$false] %s564_s21 }
  0x5a   : > { %265 = vadd.xlane.f32.xlu0 %v264_v4  ;;  %238 = vperm.xlu1 %487, %v236_v8   ;;  %s566_s24 = scalar_lea.vmem %s565_s21, 256  ;;  %p567_p13 = scmp.lt.s32.totalorder %s840_s30, %s565_s21 }
  0x5b   : > { %v214_v39 = vsub.s32 %v211_v38, %v213_v20  ;;  %p562_p9 = pnand %p561_p6, %p749_p8  ;;  %p568_p0 = scmp.lt.s32.totalorder %s566_s24, %s560_s9 }
  0x5d   : > { %p563_p12 = pneg %p562_p9  ;;  %p569_p5 = por %p568_p0, %p567_p13 }
  0x5f   : > { %p570_p10 = pnand %p569_p5, %p563_p12 }
  0xd5   : > { %v207_v40 = vpop.permute.xlu1 %206 }
  0xd6   : > { %v215_v41 = vrot.slane %v207_v40, %v214_v39 }
  0xd8   : > { %v216_v42 = vmul.f32 %v215_v41, %v812_v0 }
  0xd9   : > { %v239_v55 = vpop.permute.xlu1 %238 }
  0xda   : > { %v218_v43 = vcombine.high %v216_v42, %v216_v42  ;;  %v221_v44 = vsel %vm220_vm0, %v216_v42, 0.0  ;;  %v244_v58 = vrot.slane %v239_v55, %v243_v22 }
  0xdb   : > { %v222_v46 = vrot.slane %v221_v44, 4 }
  0xdc   : > { %v228_v45 = vsel %vm220_vm0, %v218_v43, 0.0 }
  0xdd   : > { %v229_v47 = vrot.slane %v228_v45, 4  ;;  %v223_v48 = vadd.f32 %v222_v46, %v221_v44 }
  0xdf   : > { %v230_v49 = vadd.f32 %v229_v47, %v228_v45  ;;  %v224_v50 = vrot.slane %v223_v48, 2 }
  0xe1   : > { %v231_v51 = vrot.slane %v230_v49, 2  ;;  %v225_v52 = vadd.f32 %v224_v50, %v223_v48 }
  0xe3   : > { %v232_v53 = vadd.f32 %v231_v51, %v230_v49  ;;  %v226_v54 = vrot.slane %v225_v52, 1 }
  0xe5   : > { %v233_v56 = vrot.slane %v232_v53, 1  ;;  %v227_v57 = vadd.f32 %v226_v54, %v225_v52 }
  0xe7   : > { %v266_v10 = vpop.xlane.xlu0 %265  ;;  %v234_v59 = vadd.f32 %v233_v56, %v232_v53  ;;  %v245_v60 = vadd.f32 %v244_v58, %v227_v57 }
  0xe8   : > { %v267_v11 = vmul.f32 0.00390625, %v266_v10 }
  0xe9   : > { %v246_v61 = vadd.f32 %v244_v58, %v234_v59  ;;  %v418_v62 = vmul.f32 -1.442695, %v245_v60 }
  0xea   : > { %v268_v12 = vmul.f32 %v267_v11, %v201_v9 }
  0xeb   : > { %v419_v63 = vmul.f32 -1.442695, %v246_v61 }
  0xec   : > { %v269_v13 = vsel %vm220_vm0, %v268_v12, 0.0 }
  0xed   : > { %v270_v14 = vrot.slane %v269_v13, 4 }
  0xef   : > { %v271_v15 = vadd.f32 %v270_v14, %v269_v13 }
  0xf1   : > { %v272_v16 = vrot.slane %v271_v15, 2 }
  0xf3   : > { %v273_v18 = vadd.f32 %v272_v16, %v271_v15 }
  0xf5   : > { %v274_v19 = vrot.slane %v273_v18, 1 }
  0xf7   : > { %v275_v21 = vadd.f32 %v274_v19, %v273_v18 }
  0xf9   : > { %v276_v23 = vadd.f32 %v275_v21, %v203_v6 }
  0xfb   : > { %v277_v24 = vmax.f32 %v276_v23, 0.0 }
  0xfd   : > { %v284_v26 = vrot.slane %v277_v24, %v243_v22 }
  0xff   : > { %v285_v27 = vmul.f32 %v284_v26, %v279_v25 }
 0x101   : > { %v286_v28 = vsel %vm220_vm0, %v285_v27, 0.0 }
 0x102   : > { %287 = vadd.xlane.f32.xlu0 %v286_v28 }
 0x18f   : > { %v288_v30 = vpop.xlane.xlu0 %287 }
 0x190   : > { %v291_v31 = vadd.f32 %v289_v29, %v288_v30 }
 0x192   : > { %v420_v32 = vmul.f32 -1.442695, %v291_v31 }
 0x194   : > { %490 = vpow2.f32 %v420_v32 }
 0x19e   : > { %v491_v33 = vpop.eup %490 }
 0x19f   : > { %v295_v34 = vadd.f32 1.0, %v491_v33 }
 0x1a1   : > { %492 = vrcp.f32 %v295_v34 }
 0x1a2   : > { %494 = vpow2.f32 %v418_v62 }
 0x1a3   : > { %496 = vpow2.f32 %v419_v63 }
 0x1ab   : > { %v493_v35 = vpop.eup %492 }
 0x1ac   : > { %300 = vperm.xlu0 %488, %v493_v35   ;;  %v495_v2 = vpop.eup %494 }
 0x1ad   : > { %v497_v3 = vpop.eup %496  ;;  %v253_v4 = vadd.f32 1.0, %v495_v2 }
 0x1ae   : > { %v254_v5 = vadd.f32 1.0, %v497_v3 }
 0x1af   : > { %498 = vrcp.f32 %v253_v4 }
 0x1b0   : > { %500 = vrcp.f32 %v254_v5 }
 0x1b9   : > { %v499_v6 = vpop.eup %498 }
 0x1ba   : > { %v501_v7 = vpop.eup %500 }
 0x22b   : > { %v301_v8 = vpop.permute.xlu0 %300 }
 0x22c   : > { %v303_v9 = vadd.f32 %v499_v6, %v301_v8  ;;  %v304_v10 = vadd.f32 %v501_v7, %v301_v8 }
 0x22e   : > { %v305_v11 = vmul.f32 %v303_v9, %v812_v0  ;;  %v306_v12 = vmul.f32 %v304_v10, %v816_v1 }
 0x230   : > { %v309_v13 = vcombine.low %v305_v11, %v306_v12 }
 0x232   : > { %311 = vst [vmem:[%s199_s27] sm:$0xff] %v309_v13 }
 0x233   : > { %573 = shalt.err (!%p570_p10)
}
 0x234   : > { %s574_s25 = scalar_lea.hbm %s838_s8, 128  ;;  %s578_s26 = scalar_lea.hbm %s885_s3, 256 }
 0x235   : > { %p575_p1 = scmp.ne.s32.totalorder %s838_s8, %s574_s25  ;;  %p579_p3 = scmp.lt.u32.totalorder %s838_s8, %s885_s3 }
 0x236   : > { %p580_p11 = scmp.lt.u32.totalorder %s578_s26, %s574_s25  ;;  %p582_p6 = scmp.lt.u32.totalorder %s574_s25, %s838_s8 }
 0x237   : > { %p576_p2 = pnand %p575_p1, %p749_p8 }
 0x238   : > { %p581_p4 = por %p580_p11, %p579_p3 }
 0x239   : > { %p577_p7 = pneg %p576_p2 }
 0x23a   : > { %p583_p9 = por %p582_p6, %p581_p4 }
 0x23c   : > { %p584_p12 = pnand %p583_p9, %p577_p7 }
 0x23e   : > { %587 = shalt.err (!%p584_p12)
}
 0x23f   : > { %434 = dma.vmem_to_hbm [thread:$0]  (%p749_p8), %s840_s30, 128, %s838_s8, %s313_s16  }
 0x240 PF: > { %s339_s18 = sand.u32 1, %s618_s12   ;;  %p904_p13 = scmp.ne.s32.totalorder %s890_s19, 0 }
 0x241   : > { %p905_p0 = scmp.ge.s32.totalorder %s630_s15, 2  ;;  %s340_s20 = scalar_lea.sflag [#allocation4], %s339_s18 }
 0x243   : > { %p445_p5 = pnand %p905_p0, %p904_p13 }
 0x245   : > { %613 = dma.done.wait (!%p445_p5), %s340_s20, 128  }
 0x246   : > { %615 = vsyncadd (!%p445_p5), %s340_s20, 4294967168  ;;  %p17_p10 = scmp.ge.s32.totalorder %s705_s23, 4   ;;  %s906_s12 = smov %s622_s13 }
 0x247   : > { %s907_s13 = smov %s626_s14  ;;  %s908_s14 = smov %s741_s11 }
 0x248   : > { %s909_s15 = smov %s705_s23  ;;  %19 = sbr.rel (!%p17_p10) target bundleno = 6 (0x6), region = 81 }
 0x24f   :  { %345 = vsyncpa [#allocation3], 1 }
 0x250   :  { %347 = vsyncpa [#allocation3 + $0x1], 1 }
 0x251   :  { %348 = vsyncpa [#allocation6], 1 }
 0x252   :  { %349 = vsyncpa [#allocation4], 1 }
 0x253   :  { %351 = vsyncpa [#allocation4 + $0x1], 1 }

</bundles_post_ra>
